<compile_context>
chip_gen: v6e
topology: v6e:2x2x1
jax: 0.10.0
libtpu: 0.0.40
codegen_flags: <defaults>
</compile_context>

<pallas_src>
import numpy as np

import jax
import jax.numpy as jnp
from jax import lax
from jax.experimental import pallas as pl
from jax.experimental.pallas import tpu as pltpu


def _round_up(x, m):
    return ((x + m - 1) // m) * m


def _pick_row_tile(m):
    """Row tile: 512 for large M; otherwise shrink so the grid has >= 2 blocks
    (keeps both v7x TensorCores busy via the 'parallel' grid axis)."""
    if m <= 8:
        return 8
    if m >= 1024:
        return 512
    return _round_up(pl.cdiv(m, 2), 8)


def _patch_linear_kernel(a_ref, w_ref, b_ref, o_ref):
    # a_ref: (tm, K)  patch rows (bf16)
    # w_ref: (N, K)   full Linear weight, VMEM-resident (constant index_map)
    # b_ref: (1, N)   full bias (f32), VMEM-resident
    # o_ref: (tm, N)
    # Whole-K contraction in one MXU call; the (N, K) weight is consumed in
    # transposed-contraction form, so no weight.T is ever materialized.
    acc = lax.dot_general(
        a_ref[...],
        w_ref[...],
        dimension_numbers=(((1,), (1,)), ((), ())),
        preferred_element_type=jnp.float32,
    )
    o_ref[...] = (acc + b_ref[...].astype(jnp.float32)).astype(o_ref.dtype)


def _patch_linear(patches, weight, bias, *, out_dtype):
    """(M, K) @ (N, K)^T + bias(N,), weight/bias resident in VMEM, 1D grid over M."""
    M, K = patches.shape
    N, K2 = weight.shape
    assert K == K2 and bias.shape == (N,)

    tm = _pick_row_tile(M)
    grid = (pl.cdiv(M, tm),)

    # VMEM footprint: double-buffered A tiles + (double-buffered) resident
    # weight + double-buffered output tiles + bias.  Only raise the scoped
    # limit when the resident weight actually needs it.
    est = (2 * tm * K * patches.dtype.itemsize
           + 2 * N * K * weight.dtype.itemsize
           + 2 * tm * N * np.dtype(out_dtype).itemsize
           + 2 * N * 4)
    compiler_kwargs = dict(dimension_semantics=("parallel",))
    if est > 12 * 1024 * 1024:
        compiler_kwargs["vmem_limit_bytes"] = min(int(est * 2), 48 * 1024 * 1024)

    return pl.pallas_call(
        _patch_linear_kernel,
        out_shape=jax.ShapeDtypeStruct((M, N), out_dtype),
        grid=grid,
        in_specs=[
            pl.BlockSpec((tm, K), lambda i: (i, 0)),   # stream row blocks
            pl.BlockSpec((N, K), lambda i: (0, 0)),    # weight: VMEM-resident
            pl.BlockSpec((1, N), lambda i: (0, 0)),    # bias:   VMEM-resident
        ],
        out_specs=pl.BlockSpec((tm, N), lambda i: (i, 0)),
        compiler_params=pltpu.CompilerParams(**compiler_kwargs),
    )(patches, weight, bias.reshape(1, N))


def patch_embedding(x, weight, bias, patch_size, *, compute_dtype=jnp.bfloat16):
    """x: (B, C, H, W); weight: (dim_out, patch_dim); bias: (dim_out,)."""
    B, C, H, W = x.shape
    p = patch_size
    assert H % p == 0 and W % p == 0
    h, w = H // p, W // p
    dim_out, patch_dim = weight.shape
    assert patch_dim == C * p * p

    # einops 'b c (h p1) (w p2) -> b (h w) (p1 p2 c)'.  Done as one XLA layout
    # pass in the compute dtype (bf16 halves the HBM traffic of this pass).
    # TODO(synk): fuse this rearrange into the Pallas kernel (needs a
    # Mosaic-friendly in-VMEM (C,p,w,p)->(w,p*p*C) permute) to save this extra
    # HBM round-trip of the activations.
    patches = (
        x.astype(compute_dtype)
        .reshape(B, C, h, p, w, p)
        .transpose(0, 2, 4, 3, 5, 1)          # b h w p1 p2 c
        .reshape(B * h * w, patch_dim)
    )

    out2d = _patch_linear(
        patches,
        weight.astype(compute_dtype),
        bias.astype(jnp.float32),
        out_dtype=x.dtype,
    )
    return out2d.reshape(B, h * w, dim_out)


class PatchEmbeddingParams:
    """Mirrors the PyTorch module's parameters (Linear weight + bias)."""

    def __init__(self, image_size, patch_size, dim_out, channel=3, key=None):
        if image_size % patch_size != 0:
            raise Exception("Image dimensions must be divisible by the patch size.")
        self.patch_size = patch_size
        self.dim_out = dim_out
        patch_dim = channel * patch_size ** 2
        key = jax.random.PRNGKey(0) if key is None else key
        kw, kb = jax.random.split(key)
        bound = 1.0 / (patch_dim ** 0.5)  # nn.Linear default init range
        self.weight = jax.random.uniform(
            kw, (dim_out, patch_dim), jnp.float32, -bound, bound
        )
        self.bias = jax.random.uniform(kb, (dim_out,), jnp.float32, -bound, bound)

    def __call__(self, x):
        return patch_embedding(x, self.weight, self.bias, self.patch_size)


if __name__ == "__main__":
    configs = [
        # (batch, channel, image_size, patch_size, dim_out)
        (2, 4, 16, 4, 32),    # small: M=32, tm=16, grid=(2,)
        (3, 3, 40, 4, 128),   # ragged rows: M=300, tm=152, masked last block
    ]
    key = jax.random.PRNGKey(0)
    for (batch, channel, image_size, patch_size, dim_out) in configs:
        key, k_x, k_m = jax.random.split(key, 3)
        module = PatchEmbeddingParams(
            image_size, patch_size, dim_out, channel=channel, key=k_m
        )
        x = jax.random.normal(
            k_x, (batch, channel, image_size, image_size), dtype=jnp.float32
        )

        out = jax.block_until_ready(module(x))

        # Reference: same rearrange + Linear in plain JAX, with bf16-rounded
        # operands (matching the kernel's MXU operand dtype, f32 accumulation).
        p = patch_size
        h = w = image_size // p
        patches_ref = (
            x.reshape(batch, channel, h, p, w, p)
            .transpose(0, 2, 4, 3, 5, 1)
            .reshape(batch, h * w, p * p * channel)
        )
        pr = patches_ref.astype(jnp.bfloat16).astype(jnp.float32)
        wr = module.weight.astype(jnp.bfloat16).astype(jnp.float32)
        ref = pr @ wr.T + module.bias

        assert out.shape == (batch, h * w, dim_out)
        assert out.dtype == x.dtype
        assert jnp.allclose(out, ref, atol=1e-2, rtol=1e-2), "mismatch vs reference"

    print("KERNEL_OK")
</pallas_src>

<mosaic_0001>
module attributes {stable_mosaic.version = 11 : i64} {
  func.func @_patch_linear_kernel(%arg0: i32, %arg1: memref<16x64xbf16, #tpu.memory_space<vmem>>, %arg2: memref<32x64xbf16, #tpu.memory_space<vmem>>, %arg3: memref<1x32xf32, #tpu.memory_space<vmem>>, %arg4: memref<16x32xf32, #tpu.memory_space<vmem>>) attributes {dimension_semantics = [#tpu.dimension_semantics<parallel>], iteration_bounds = array<i64: 2>, scalar_prefetch = 0 : i64, scratch_operands = 0 : i64, tpu.core_type = #tpu.core_type<tc>, window_params = [{transform_indices = @transform_0, window_bounds = array<i64: 16, 64>}, {pipeline_mode = #tpu.pipeline_mode<synchronous>, transform_indices = @transform_1, window_bounds = array<i64: 32, 64>}, {pipeline_mode = #tpu.pipeline_mode<synchronous>, transform_indices = @transform_2, window_bounds = array<i64: 1, 32>}, {transform_indices = @transform_3, window_bounds = array<i64: 16, 32>}]} {
    %c0 = arith.constant 0 : index
    %c0_0 = arith.constant 0 : index
    %0 = vector.load %arg1[%c0, %c0_0] : memref<16x64xbf16, #tpu.memory_space<vmem>>, vector<16x64xbf16>
    %c0_1 = arith.constant 0 : index
    %c0_2 = arith.constant 0 : index
    %1 = vector.load %arg2[%c0_1, %c0_2] : memref<32x64xbf16, #tpu.memory_space<vmem>>, vector<32x64xbf16>
    %cst = arith.constant dense<0.000000e+00> : vector<16x32xf32>
    %2 = tpu.matmul %0, %1, %cst {dimension_numbers = #tpu.dot_dimension_numbers<[1], [1], [0], [0], [0, 0, 1, 0], [], []>} : vector<16x64xbf16>, vector<32x64xbf16>, vector<16x32xf32> -> vector<16x32xf32>
    %c0_3 = arith.constant 0 : index
    %c0_4 = arith.constant 0 : index
    %3 = vector.load %arg3[%c0_3, %c0_4] : memref<1x32xf32, #tpu.memory_space<vmem>>, vector<1x32xf32>
    %4 = vector.broadcast %3 : vector<1x32xf32> to vector<16x32xf32>
    %5 = arith.addf %2, %4 : vector<16x32xf32>
    %c0_5 = arith.constant 0 : index
    %c0_6 = arith.constant 0 : index
    %6 = vector.load %arg4[%c0_5, %c0_6] : memref<16x32xf32, #tpu.memory_space<vmem>>, vector<16x32xf32>
    tpu.vector_store %arg4[%c0_5, %c0_6], %5 {strides = array<i32>} : memref<16x32xf32, #tpu.memory_space<vmem>>, vector<16x32xf32>,
    return
  }
  func.func @transform_0(%arg0: i32) -> (i32, i32) {
    %c0_i32 = arith.constant 0 : i32
    %c0_i32_0 = arith.constant 0 : i32
    return %arg0, %c0_i32 : i32, i32
  }
  func.func @transform_1(%arg0: i32) -> (i32, i32) {
    %c0_i32 = arith.constant 0 : i32
    %c0_i32_0 = arith.constant 0 : i32
    %c0_i32_1 = arith.constant 0 : i32
    return %c0_i32, %c0_i32_0 : i32, i32
  }
  func.func @transform_2(%arg0: i32) -> (i32, i32) {
    %c0_i32 = arith.constant 0 : i32
    %c0_i32_0 = arith.constant 0 : i32
    %c0_i32_1 = arith.constant 0 : i32
    return %c0_i32, %c0_i32_0 : i32, i32
  }
  func.func @transform_3(%arg0: i32) -> (i32, i32) {
    %c0_i32 = arith.constant 0 : i32
    %c0_i32_0 = arith.constant 0 : i32
    return %arg0, %c0_i32 : i32, i32
  }
}

</mosaic_0001>

<bundles_post_ra>
// kernel: tpu_custom_call.1
= control target key start
LH: loop header
LB: loop body
LE: loop exit
PB: predicated region body
PF: predicated region fallthrough
CT: control target
= control target key end

     0   :  { %8 = vsyncpa [#allocation3], 0  ;;  %s826_s0 = inlined_call_operand.hbm [shape: bf16[32,64], index: 0, kind: input, shape index: {}]   ;;  %s827_s1 = inlined_call_operand.hbm [shape: bf16[32,64], index: 1, kind: input, shape index: {}]   ;;  %s828_s2 = inlined_call_operand.vmem [shape: f32[1,32], index: 2, kind: input, shape index: {}]   ;;  %s829_s3 = inlined_call_operand.hbm [shape: f32[32,32], index: 3, kind: output, shape index: {}]  }
   0x1   :  { %10 = vsyncpa [#allocation3 + $0x1], 0 }
   0x2   :  { %11 = vsyncpa [#allocation6], 0 }
   0x3   :  { %12 = vsyncpa [#allocation4], 0 }
   0x4   :  { %14 = vsyncpa [#allocation4 + $0x1], 0  ;;  %s639_s12 = smov 0   ;;  %s641_s13 = smov 0  }
   0x5   :  { %s643_s14 = smov 0   ;;  %s645_s15 = smov 0  }
   0x6 LB: > { %s660_s16 = sadd.s32 4294967295, %s608_s15   ;;  %s386_s17 = sadd.s32 4294967294, %s608_s15   ;;  %s608_s15 = sphi %s645_s15, %s851_s15   ;;  %s604_s14 = sphi %s643_s14, %s850_s14   ;;  %s600_s13 = sphi %s641_s13, %s849_s13   ;;  %s596_s12 = sphi %s639_s12, %s848_s12  }
   0x7   : > { %p40_p0 = scmp.ne.s32.totalorder %s600_s13, %s596_s12  ;;  %p830_p1 = scmp.eq.s32.totalorder %s660_s16, 0 }
   0x8   : > { %p112_p3 = scmp.eq.s32.totalorder %s386_s17, 1  ;;  %p387_p5 = scmp.ge.s32.totalorder %s608_s15, 1 }
   0x9   : > { %p669_p4 = por %p830_p1, %p40_p0  ;;  %p119_p7 = scmp.lt.s32.totalorder %s608_s15, 3 }
   0xa   : > { %p674_p6 = por %p112_p3, %p40_p0  ;;  %s610_s21 = smov [#allocation5]  }
   0xb   : > { %s834_s18 = scalar_select %p669_p4, 1, 0 }
   0xc   : > { %s835_s19 = scalar_select %p674_p6, 1, 0 }
   0xd   : > { %p679_p8 = pnand %p387_p5, %p119_p7  ;;  %s131_s22 = sshll.u32 %s610_s21, 4  ;;  %s132_s22 = int_to_ptr.vmem [resolvable:$true] %s131_s22 }
   0xe   : > { %s693_s24 = sadd.s32 1, %s608_s15   ;;  %s27_s25 = sadd.s32 1, %s604_s14 }
   0xf   : > { %s836_s20 = scalar_select %p679_p8, 1, 0 }
  0x10   : > { %p428_p9 = pneg %p679_p8  ;;  %s24_s26 = ssub.s32 %s608_s15, %s693_s24 }
  0x11   : > { %s497_s27 = scalar_lea.vmem %s132_s22, 256  ;;  %p505_p5 = scmp.lt.s32.totalorder %s132_s22, %s132_s22 }
  0x12   : > { %p688_p11 = pnand %p428_p9, %p830_p1  ;;  %p498_p13 = scmp.ne.s32.totalorder %s132_s22, %s497_s27 }
  0x13   : > { %p506_p7 = scmp.lt.s32.totalorder %s497_s27, %s497_s27 }
  0x14   : > { %p488_p12 = pneg %p688_p11 }
  0x15   : > { %p507_p10 = por %p506_p7, %p505_p5 }
  0x16   : > { %p500_p0 = pnand %p498_p13, %p488_p12 }
  0x18   : > { %p501_p3 = pneg %p500_p0 }
  0x1a   : > { %p508_p2 = pnand %p507_p10, %p501_p3 }
  0x1c   : > { %511 = shalt.err (!%p508_p2)
}
  0x1d   : > { %s611_s28 = smov 64   ;;  %s612_s29 = smov 4  }
  0x1e   : > { %431 = dma.hbm_to_vmem [thread:$0]  (!%p688_p11), %s827_s1, 256, %s132_s22, [#allocation6], %s611_s28, %s611_s28, %s612_s29  }
  0x1f   : > { %p25_p2 = scmp.eq.s32.totalorder %s24_s26, 0  ;;  %p34_p9 = scmp.ne.s32.totalorder %s604_s14, %s600_s13 }
  0x20   : > { %p35_p10 = scmp.eq.s32.totalorder %s608_s15, 0  ;;  %p441_p12 = scmp.lt.s32.totalorder %s608_s15, 2 }
  0x21   : > { %s713_s5 = scalar_select %p25_p2, %s604_s14, %s27_s25  }
  0x22   : > { %p36_p13 = por %p35_p10, %p34_p9  ;;  %p838_p0 = scmp.eq.s32.totalorder %s660_s16, 1 }
  0x23   : > { %s148_s7 = sand.u32 1, %s604_s14   ;;  %s407_s8 = sshll.u32 %s608_s15, 7 }
  0x24   : > { %p717_p3 = por %p838_p0, %p34_p9  ;;  %s390_s9 = sshll.u32 %s148_s7, 3 }
  0x25   : > { %s726_s17 = scalar_lea.hbm %s826_s0, %s407_s8  ;;  %s152_s21 = scalar_lea.vmem [#allocation2], %s390_s9 }
  0x26   : > { %s839_s6 = scalar_select %p717_p3, 1, 0 }
  0x27   : > { %s159_s22 = sshll.u32 %s152_s21, 4  ;;  %p728_p11 = pnand %p441_p12, %p36_p13  ;;  %s732_s22 = int_to_ptr.vmem [resolvable:$true] %s159_s22 }
  0x28   : > { %s734_s25 = scalar_lea.sflag [#allocation3], %s148_s7  ;;  %s512_s26 = scalar_lea.hbm %s726_s17, 128 }
  0x29   : > { %p513_p5 = scmp.ne.s32.totalorder %s726_s17, %s512_s26  ;;  %p514_p7 = pneg %p728_p11 }
  0x2a   : > { %s517_s4 = scalar_lea.hbm %s826_s0, 256  ;;  %p518_p10 = scmp.lt.s32.totalorder %s726_s17, %s826_s0 }
  0x2b   : > { %p515_p2 = pnand %p514_p7, %p513_p5  ;;  %p519_p12 = scmp.lt.s32.totalorder %s517_s4, %s512_s26 }
  0x2d   : > { %p516_p9 = pneg %p515_p2  ;;  %p520_p13 = por %p519_p12, %p518_p10 }
  0x2f   : > { %p521_p0 = pnand %p520_p13, %p516_p9 }
  0x31   : > { %524 = shalt.err (!%p521_p0)
}
  0x32   : > { %s525_s7 = scalar_lea.vmem %s732_s22, 128  ;;  %s613_s10 = smov [#allocation2]  }
  0x33   : > { %p526_p1 = scmp.ne.s32.totalorder %s732_s22, %s525_s7  ;;  %s530_s11 = sshll.u32 %s613_s10, 4  ;;  %s531_s11 = int_to_ptr.vmem [resolvable:$false] %s530_s11 }
  0x34   : > { %s532_s21 = scalar_lea.vmem %s531_s11, 256  ;;  %p533_p2 = scmp.lt.s32.totalorder %s732_s22, %s531_s11 }
  0x35   : > { %p528_p6 = pnand %p526_p1, %p514_p7  ;;  %p534_p3 = scmp.lt.s32.totalorder %s532_s21, %s525_s7 }
  0x37   : > { %p529_p5 = pneg %p528_p6  ;;  %p535_p4 = por %p534_p3, %p533_p2 }
  0x39   : > { %p536_p8 = pnand %p535_p4, %p529_p5 }
  0x3b   : > { %539 = shalt.err (!%p536_p8)
}
  0x3c   : > { %435 = dma.hbm_to_vmem [thread:$0]  (!%p728_p11), %s726_s17, 128, %s732_s22, %s734_s25, %s611_s28, %s611_s28, %s612_s29  }
  0x3d   : > { %p841_p1 = scmp.ne.s32.totalorder %s836_s20, 0 }
  0x3e   : > { %s761_s26 = sand.u32 (!%p841_p1), 1, %s600_s13   ;;  %p842_p4 = scmp.ne.s32.totalorder (!%p841_p1), %s834_s18, 0 }
  0x3f   : > { %171 = sbr.rel (%p841_p1) target bundleno = 302 (0x12e), region = 32  ;;  %s394_s27 = sshll.u32 (!%p841_p1), %s761_s26, 3 }
  0x40   : > { %s174_s30 = scalar_lea.sflag (!%p841_p1), [#allocation3], %s761_s26  ;;  %s177_s4 = scalar_lea.vmem (!%p841_p1), [#allocation2], %s394_s27 }
  0x44   : > { %583 = dma.done.wait (%p842_p4), %s174_s30, 128  }
  0x45   : > { %585 = vsyncadd (%p842_p4), %s174_s30, 4294967168  ;;  %p843_p6 = scmp.eq.s32.totalorder %s660_s16, 0 }
  0x47   : > { %587 = dma.done.wait (%p843_p6), [#allocation6], 256   ;;  %p844_p8 = pmov %p843_p6 }
  0x48   : > { %v614_v0 = vmov 0.0   ;;  %vm615_vm0 = vmmov 0   ;;  %vm235_vm1 = vcmask 523264   ;;  %v483_v1 = vld [vmem:[#allocation5 + $0x8] sm:$0xff]   ;;  %v484_v3 = vld [vmem:[#allocation5] sm:$0xff]   ;;  %v485_v5 = vld [vmem:[%s177_s4] sm:$0xff]  }
  0x49   : > { %589 = vsyncadd (%p844_p8), [#allocation6], 4294967040  ;;  %412 = vmatprep.subr.bf16.mxu0 %v614_v0  ;;  %416 = vmatprep.mubr.msk.bf16.mxu0 %vm615_vm0, %v614_v0  ;;  %v243_v2 = vsel %vm235_vm1, %v483_v1, 0  ;;  %v240_v4 = vsel %vm235_vm1, %v484_v3, 0  ;;  %s396_s18 = sshll.u32 %s761_s26, 4  ;;  %vm286_vm2 = vcmask 261120  }
  0x4a   : > { %413 = vmatpush3.bf16.xpose.msra.mxu0 %v243_v2  ;;  %v397_v6 = vld [vmem:[%s828_s2] ss:$0 sm:$0xff]  ;;  %s203_s29 = scalar_lea.vmem [#allocation7], %s396_s18  ;;  %s408_s22 = sshll.u32 %s660_s16, 8 }
  0x4b   : > { %414 = vmatprep.subr.bf16.mxu0 %v614_v0  ;;  %s303_s17 = sshll.u32 %s203_s29, 4  ;;  %s783_s8 = scalar_lea.hbm %s829_s3, %s408_s22  ;;  %s778_s17 = int_to_ptr.vmem [resolvable:$true] %s303_s17 }
  0x4c   : > { %s290_s9 = scalar_lea.sflag [#allocation4], %s761_s26  ;;  %s540_s7 = scalar_lea.vmem %s778_s17, 256 }
  0x4d   : > { %p541_p3 = scmp.ne.s32.totalorder %s778_s17, %s540_s7  ;;  %p845_p11 = scmp.ne.s32.totalorder %s839_s6, 0 }
  0x4e   : > { %s616_s16 = smov [#allocation7]  }
  0x4f   : > { %p542_p7 = pnand %p541_p3, %p845_p11  ;;  %s544_s10 = sshll.u32 %s616_s16, 4  ;;  %s545_s10 = int_to_ptr.vmem [resolvable:$false] %s544_s10 }
  0x50   : > { %s546_s11 = scalar_lea.vmem %s545_s10, 512  ;;  %p547_p10 = scmp.lt.s32.totalorder %s778_s17, %s545_s10 }
  0x51   : > { %p543_p9 = pneg %p542_p7  ;;  %p548_p12 = scmp.lt.s32.totalorder %s546_s11, %s540_s7 }
  0x52   : > { %415 = vmatpush3.bf16.xpose.msra.mxu0 %v240_v4 }
  0x53   : > { %p549_p13 = por %p548_p12, %p547_p10 }
  0x55   : > { %p550_p0 = pnand %p549_p13, %p543_p9 }
  0x59   : > { %417 = vmatmul.mubr.msk.bf16.vlgmr.msra.gmra.mxu0 %vm235_vm1, %v485_v5 }
 0x119   : > { %v279_v7 = vpop.f32.mrf.mxu0 }
 0x11a   : > { %v280_v8 = vadd.f32 %v397_v6, %v279_v7 }
 0x11b   : > { %v418_v9 = vpop.f32.mrf.mxu0 }
 0x11c   : > { %287 = vst.msk [vmem:[%s203_s29] sm:$0xff] %vm286_vm2, %v280_v8 }
 0x11d   : > { %v282_v10 = vpop.f32.mrf.mxu0 }
 0x11e   : > { %v283_v11 = vadd.f32 %v397_v6, %v282_v10 }
 0x11f   : > { %v419_v12 = vpop.f32.mrf.mxu0 }
 0x120   : > { %288 = vst.msk [vmem:[%s203_s29 + $0x8] sm:$0xff] %vm286_vm2, %v283_v11 }
 0x121   : > { %553 = shalt.err (!%p550_p0)
}
 0x122   : > { %s554_s21 = scalar_lea.hbm %s783_s8, 256  ;;  %s558_s4 = scalar_lea.hbm %s829_s3, 512 }
 0x123   : > { %p555_p5 = scmp.ne.s32.totalorder %s783_s8, %s554_s21  ;;  %p559_p4 = scmp.lt.s32.totalorder %s783_s8, %s829_s3 }
 0x124   : > { %p560_p6 = scmp.lt.s32.totalorder %s558_s4, %s554_s21 }
 0x125   : > { %p556_p2 = pnand %p555_p5, %p845_p11 }
 0x126   : > { %p561_p8 = por %p560_p6, %p559_p4 }
 0x127   : > { %p557_p1 = pneg %p556_p2 }
 0x129   : > { %p562_p3 = pnand %p561_p8, %p557_p1 }
 0x12b   : > { %565 = shalt.err (!%p562_p3)
}
 0x12c   : > { %s617_s28 = smov 128   ;;  %s618_s29 = smov 8  }
 0x12d   : > { %426 = dma.vmem_to_hbm [thread:$0]  (%p845_p11), %s778_s17, 256, %s783_s8, %s290_s9, %s617_s28, %s617_s28, %s618_s29  }
 0x12e PF: > { %s318_s22 = sand.u32 1, %s596_s12   ;;  %p846_p7 = scmp.ne.s32.totalorder %s835_s19, 0 }
 0x12f   : > { %p847_p9 = scmp.ge.s32.totalorder %s608_s15, 2  ;;  %s319_s23 = scalar_lea.sflag [#allocation4], %s318_s22 }
 0x131   : > { %p437_p10 = pnand %p847_p9, %p846_p7 }
 0x133   : > { %p438_p12 = pneg %p437_p10 }
 0x135   : > { %591 = dma.done.wait (%p438_p12), %s319_s23, 256  }
 0x136   : > { %593 = vsyncadd (%p438_p12), %s319_s23, 4294967040  ;;  %p17_p13 = scmp.ge.s32.totalorder %s693_s24, 4   ;;  %s848_s12 = smov %s600_s13 }
 0x137   : > { %s849_s13 = smov %s604_s14  ;;  %s850_s14 = smov %s713_s5 }
 0x138   : > { %s851_s15 = smov %s693_s24  ;;  %19 = sbr.rel (!%p17_p13) target bundleno = 6 (0x6), region = 81 }
 0x13d   :  { %324 = vsyncpa [#allocation3], 1 }
 0x13e   :  { %326 = vsyncpa [#allocation3 + $0x1], 1 }
 0x13f   :  { %327 = vsyncpa [#allocation6], 1 }
 0x140   :  { %328 = vsyncpa [#allocation4], 1 }
 0x141   :  { %330 = vsyncpa [#allocation4 + $0x1], 1 }

</bundles_post_ra>
